<compile_context>
chip_gen: v7x
topology: tpu7x:2x2x1
jax: 0.10.0
libtpu: 0.0.40
codegen_flags: <defaults>
</compile_context>

<pallas_src>
import functools

import jax
import jax.numpy as jnp
from jax.experimental import pallas as pl
from jax.experimental.pallas import tpu as pltpu


def attention_kernel(x_ref, w_ref, o_ref, *, seq_len):
    # x_ref: (TILE_M, D) rows of the flattened (B*S, D) input, TILE_M = TILE_B*S
    # w_ref: (D, D)      weight matrix (constant index_map -> fetched once)
    # o_ref: (TILE_B, D) lane-dense output block
    x = x_ref[...]                       # native dtype (f32 here; bf16 ok on v6e/v7x)
    w = w_ref[...]
    tile_m, d = x.shape
    tile_b = o_ref.shape[0]

    # attention_scores = x @ W : one big MXU pass per grid step, f32 accumulate.
    scores = jnp.dot(x, w, preferred_element_type=jnp.float32)      # (TILE_M, D)

    # Row softmax (max-stabilized), math in f32.  Exact reciprocal keeps parity
    # with the PyTorch softmax; the divide is nowhere near the bottleneck.
    m = jnp.max(scores, axis=-1, keepdims=True)
    e = jnp.exp(scores - m)
    denom = jnp.sum(e, axis=-1, keepdims=True)
    attn = e * pl.reciprocal(denom)                                  # (TILE_M, D)

    # x * attn in x's native dtype: no full-tile f32 copy of x, bf16 inputs stay
    # on the fast path; the reduce below accumulates in f32.
    weighted = x * attn.astype(x.dtype)                              # (TILE_M, D)

    # context[b] = sum_s weighted[b*S + s]: sublane-group reduce (XLU/VALU adds,
    # which are idle here) instead of an extra segment-sum MXU matmul.
    ctx = jnp.sum(weighted.reshape(tile_b, seq_len, d), axis=1, dtype=jnp.float32)

    o_ref[...] = ctx.astype(o_ref.dtype)


def _vmem_limit_bytes():
    """~75% of physical VMEM: ~96 MiB on v5e/v6e (128 MiB), ~48 MiB on v7x (64 MiB)."""
    try:
        cap = int(pltpu.get_tpu_info().vmem_capacity_bytes)
    except Exception:
        cap = 64 << 20  # conservative fallback (v7x physical size)
    return max(32 << 20, min((cap * 3) // 4, 96 << 20))


def _vmem_estimate_bytes(tile_b, S, D, x_bytes, w_bytes):
    """Rough per-call VMEM footprint for a given tile choice."""
    tile_m = tile_b * S
    est = 2 * tile_m * D * x_bytes        # x tile, double-buffered
    est += 2 * D * D * w_bytes            # W (worst case: double-buffered)
    est += 3 * tile_m * D * 4             # f32 scores / exp / attn surfaces
    est += 2 * tile_b * D * 4             # output tile, double-buffered
    return est


def _choose_tile_b(B, S, D, x_bytes, w_bytes, vmem_budget, target_rows=1024):
    """How many batch elements (whole sequences) to process per grid step.

    TILE_B must divide B and be a multiple of 8 (or == B) so every block
    satisfies the (8, 128) block-shape rule.  Aim for ~target_rows rows per
    MXU pass (the kernel is HBM-bound; big tiles amortize the ~0.35 us/step
    pipeline overhead) but stay inside the VMEM budget.  Prefer an even
    number (>= 2) of grid steps so both v7x TensorCores get work, as long as
    each step keeps >= 128 rows.
    """
    divisors = [tb for tb in range(1, B + 1) if B % tb == 0]
    aligned = [tb for tb in divisors if tb % 8 == 0 or tb == B]
    fitting = [tb for tb in aligned
               if tb * S <= target_rows
               and _vmem_estimate_bytes(tb, S, D, x_bytes, w_bytes) <= vmem_budget]
    tile_b = max(fitting) if fitting else min(aligned)
    steps = B // tile_b
    if steps < 2 or steps % 2 == 1:
        better = [tb for tb in aligned
                  if tb <= tile_b and (B // tb) >= 2 and (B // tb) % 2 == 0
                  and tb * S >= 128]
        if better:
            tile_b = max(better)
    return tile_b


def attention_forward(x, w, tile_b=None):
    B, S, D = x.shape
    assert w.shape == (D, D), "input_dim must equal hidden_dim (torch broadcast x * attn)"

    vmem_limit = _vmem_limit_bytes()
    if tile_b is None:
        tile_b = _choose_tile_b(B, S, D, x.dtype.itemsize, w.dtype.itemsize,
                                vmem_budget=vmem_limit // 2)
    assert B % tile_b == 0
    tile_m = tile_b * S

    # Free wrapper reshape: flat, row-tiled (B*S, D) LHS slab; lane-dense (B, D)
    # output (note: D < 128 means masked stores — keep D >= 128 when benchmarking).
    x_flat = x.reshape(B * S, D)
    kernel = functools.partial(attention_kernel, seq_len=S)

    def make_call(single_buffer_w):
        # W never changes across the grid; single-buffering it hands
        # 2*D*D*sizeof(W) of VMEM back (matters on v7x's 64 MiB).
        if single_buffer_w:
            w_spec = pl.BlockSpec((D, D), lambda b: (0, 0), pipeline_mode=pl.Buffered(1))
        else:
            w_spec = pl.BlockSpec((D, D), lambda b: (0, 0))
        return pl.pallas_call(
            kernel,
            out_shape=jax.ShapeDtypeStruct((B, D), x.dtype),
            grid=(B // tile_b,),
            in_specs=[
                pl.BlockSpec((tile_m, D), lambda b: (b, 0)),
                w_spec,
            ],
            out_specs=pl.BlockSpec((tile_b, D), lambda b: (b, 0)),
            compiler_params=pltpu.CompilerParams(
                dimension_semantics=("parallel",),
                vmem_limit_bytes=vmem_limit,
            ),
        )

    try:
        return jax.block_until_ready(make_call(True)(x_flat, w))
    except Exception:
        # Fallback if single-buffered pipelining of the constant W operand is
        # not supported by the installed jax/Mosaic version.
        return make_call(False)(x_flat, w)


def reference_forward(x, w):
    scores = jnp.einsum("bsh,hd->bsd", x, w)
    attn = jax.nn.softmax(scores, axis=-1)
    return jnp.sum(x * attn, axis=1)


if __name__ == "__main__":
    batch, seq, hidden = 2, 8, 32
    input_dim = hidden  # must equal hidden_dim for the torch broadcast to be valid

    key = jax.random.PRNGKey(0)
    kx, kw = jax.random.split(key)
    x = jax.random.normal(kx, (batch, seq, hidden), dtype=jnp.float32)
    # deterministic stand-in for nn.Parameter(torch.randn(hidden_dim, input_dim))
    attention_weights = jax.random.normal(kw, (hidden, input_dim), dtype=jnp.float32)

    out = attention_forward(x, attention_weights)
    out = jax.block_until_ready(out)

    ref = reference_forward(x, attention_weights)
    assert out.shape == (batch, hidden)
    assert jnp.allclose(out, ref, atol=1e-3, rtol=1e-3), "mismatch vs reference"

    print("KERNEL_OK")
</pallas_src>

<mosaic_0001>
module attributes {stable_mosaic.version = 11 : i64} {
  func.func @attention_kernel(%arg0: i32, %arg1: memref<16x32xf32, #tpu.memory_space<vmem>>, %arg2: memref<32x32xf32, #tpu.memory_space<vmem>>, %arg3: memref<2x32xf32, #tpu.memory_space<vmem>>) attributes {dimension_semantics = [#tpu.dimension_semantics<parallel>], iteration_bounds = array<i64: 1>, scalar_prefetch = 0 : i64, scratch_operands = 0 : i64, tpu.core_type = #tpu.core_type<tc>, window_params = [{transform_indices = @transform_0, window_bounds = array<i64: 16, 32>}, {pipeline_mode = #tpu.pipeline_mode<synchronous>, transform_indices = @transform_1, window_bounds = array<i64: 32, 32>}, {transform_indices = @transform_2, window_bounds = array<i64: 2, 32>}]} {
    %c0 = arith.constant 0 : index
    %c0_0 = arith.constant 0 : index
    %0 = vector.load %arg1[%c0, %c0_0] : memref<16x32xf32, #tpu.memory_space<vmem>>, vector<16x32xf32>
    %c0_1 = arith.constant 0 : index
    %c0_2 = arith.constant 0 : index
    %1 = vector.load %arg2[%c0_1, %c0_2] : memref<32x32xf32, #tpu.memory_space<vmem>>, vector<32x32xf32>
    %cst = arith.constant dense<0.000000e+00> : vector<16x32xf32>
    %2 = tpu.matmul %0, %1, %cst {dimension_numbers = #tpu.dot_dimension_numbers<[1], [0], [0], [1], [0, 0, 1, 1], [], []>} : vector<16x32xf32>, vector<32x32xf32>, vector<16x32xf32> -> vector<16x32xf32>
    %cst_3 = arith.constant dense<0xFF800000> : vector<16xf32>
    %3 = vector.multi_reduction <maximumf>, %2, %cst_3 [1] : vector<16x32xf32> to vector<16xf32>
    %4 = vector.shape_cast %3 : vector<16xf32> to vector<16x1xf32>
    %5 = vector.broadcast %4 : vector<16x1xf32> to vector<16x32xf32>
    %6 = arith.subf %2, %5 : vector<16x32xf32>
    %7 = math.exp %6 : vector<16x32xf32>
    %cst_4 = arith.constant dense<0.000000e+00> : vector<16xf32>
    %8 = vector.multi_reduction <add>, %7, %cst_4 [1] : vector<16x32xf32> to vector<16xf32>
    %9 = vector.shape_cast %8 : vector<16xf32> to vector<16x1xf32>
    %10 = tpu.reciprocal %9 : vector<16x1xf32> -> vector<16x1xf32>
    %11 = vector.broadcast %10 : vector<16x1xf32> to vector<16x32xf32>
    %12 = arith.mulf %7, %11 : vector<16x32xf32>
    %13 = arith.mulf %0, %12 : vector<16x32xf32>
    %14 = vector.shape_cast %13 : vector<16x32xf32> to vector<2x8x32xf32>
    %cst_5 = arith.constant dense<0.000000e+00> : vector<2x32xf32>
    %15 = vector.multi_reduction <add>, %14, %cst_5 [1] : vector<2x8x32xf32> to vector<2x32xf32>
    %c0_6 = arith.constant 0 : index
    %c0_7 = arith.constant 0 : index
    %16 = vector.load %arg3[%c0_6, %c0_7] : memref<2x32xf32, #tpu.memory_space<vmem>>, vector<2x32xf32>
    tpu.vector_store %arg3[%c0_6, %c0_7], %15 {strides = array<i32>} : memref<2x32xf32, #tpu.memory_space<vmem>>, vector<2x32xf32>,
    return
  }
  func.func @transform_0(%arg0: i32) -> (i32, i32) {
    %c0_i32 = arith.constant 0 : i32
    %c0_i32_0 = arith.constant 0 : i32
    return %arg0, %c0_i32 : i32, i32
  }
  func.func @transform_1(%arg0: i32) -> (i32, i32) {
    %c0_i32 = arith.constant 0 : i32
    %c0_i32_0 = arith.constant 0 : i32
    %c0_i32_1 = arith.constant 0 : i32
    return %c0_i32, %c0_i32_0 : i32, i32
  }
  func.func @transform_2(%arg0: i32) -> (i32, i32) {
    %c0_i32 = arith.constant 0 : i32
    %c0_i32_0 = arith.constant 0 : i32
    return %arg0, %c0_i32 : i32, i32
  }
}

module attributes {stable_mosaic.version = 11 : i64} {
  func.func @attention_kernel(%arg0: i32, %arg1: memref<16x32xf32, #tpu.memory_space<vmem>>, %arg2: memref<32x32xf32, #tpu.memory_space<vmem>>, %arg3: memref<2x32xf32, #tpu.memory_space<vmem>>) attributes {dimension_semantics = [#tpu.dimension_semantics<parallel>], iteration_bounds = array<i64: 1>, scalar_prefetch = 0 : i64, scratch_operands = 0 : i64, tpu.core_type = #tpu.core_type<tc>, window_params = [{transform_indices = @transform_0, window_bounds = array<i64: 16, 32>}, {pipeline_mode = #tpu.pipeline_mode<synchronous>, transform_indices = @transform_1, window_bounds = array<i64: 32, 32>}, {transform_indices = @transform_2, window_bounds = array<i64: 2, 32>}]} {
    %c0 = arith.constant 0 : index
    %c0_0 = arith.constant 0 : index
    %0 = vector.load %arg1[%c0, %c0_0] : memref<16x32xf32, #tpu.memory_space<vmem>>, vector<16x32xf32>
    %c0_1 = arith.constant 0 : index
    %c0_2 = arith.constant 0 : index
    %1 = vector.load %arg2[%c0_1, %c0_2] : memref<32x32xf32, #tpu.memory_space<vmem>>, vector<32x32xf32>
    %cst = arith.constant dense<0.000000e+00> : vector<16x32xf32>
    %2 = tpu.matmul %0, %1, %cst {dimension_numbers = #tpu.dot_dimension_numbers<[1], [0], [0], [1], [0, 0, 1, 1], [], []>} : vector<16x32xf32>, vector<32x32xf32>, vector<16x32xf32> -> vector<16x32xf32>
    %cst_3 = arith.constant dense<0xFF800000> : vector<16xf32>
    %3 = vector.multi_reduction <maximumf>, %2, %cst_3 [1] : vector<16x32xf32> to vector<16xf32>
    %4 = vector.shape_cast %3 : vector<16xf32> to vector<16x1xf32>
    %5 = vector.broadcast %4 : vector<16x1xf32> to vector<16x32xf32>
    %6 = arith.subf %2, %5 : vector<16x32xf32>
    %7 = math.exp %6 : vector<16x32xf32>
    %cst_4 = arith.constant dense<0.000000e+00> : vector<16xf32>
    %8 = vector.multi_reduction <add>, %7, %cst_4 [1] : vector<16x32xf32> to vector<16xf32>
    %9 = vector.shape_cast %8 : vector<16xf32> to vector<16x1xf32>
    %10 = tpu.reciprocal %9 : vector<16x1xf32> -> vector<16x1xf32>
    %11 = vector.broadcast %10 : vector<16x1xf32> to vector<16x32xf32>
    %12 = arith.mulf %7, %11 : vector<16x32xf32>
    %13 = arith.mulf %0, %12 : vector<16x32xf32>
    %14 = vector.shape_cast %13 : vector<16x32xf32> to vector<2x8x32xf32>
    %cst_5 = arith.constant dense<0.000000e+00> : vector<2x32xf32>
    %15 = vector.multi_reduction <add>, %14, %cst_5 [1] : vector<2x8x32xf32> to vector<2x32xf32>
    %c0_6 = arith.constant 0 : index
    %c0_7 = arith.constant 0 : index
    %16 = vector.load %arg3[%c0_6, %c0_7] : memref<2x32xf32, #tpu.memory_space<vmem>>, vector<2x32xf32>
    tpu.vector_store %arg3[%c0_6, %c0_7], %15 {strides = array<i32>} : memref<2x32xf32, #tpu.memory_space<vmem>>, vector<2x32xf32>,
    return
  }
  func.func @transform_0(%arg0: i32) -> (i32, i32) {
    %c0_i32 = arith.constant 0 : i32
    %c0_i32_0 = arith.constant 0 : i32
    return %arg0, %c0_i32 : i32, i32
  }
  func.func @transform_1(%arg0: i32) -> (i32, i32) {
    %c0_i32 = arith.constant 0 : i32
    %c0_i32_0 = arith.constant 0 : i32
    %c0_i32_1 = arith.constant 0 : i32
    return %c0_i32, %c0_i32_0 : i32, i32
  }
  func.func @transform_2(%arg0: i32) -> (i32, i32) {
    %c0_i32 = arith.constant 0 : i32
    %c0_i32_0 = arith.constant 0 : i32
    return %arg0, %c0_i32 : i32, i32
  }
}

</mosaic_0001>

<bundles_post_ra>
// kernel: tpu_custom_call.1
= control target key start
LH: loop header
LB: loop body
LE: loop exit
PB: predicated region body
PF: predicated region fallthrough
CT: control target
= control target key end

     0   :  { %7 = vsyncpa [#allocation3], 0  ;;  %s365_s0 = inlined_call_operand.hbm [shape: f32[16,32], index: 0, kind: input, shape index: {}]   ;;  %s366_s1 = inlined_call_operand.hbm [shape: f32[32,32], index: 1, kind: input, shape index: {}]   ;;  %s367_s2 = inlined_call_operand.hbm [shape: f32[2,32], index: 2, kind: output, shape index: {}]  }
   0x1   :  { %8 = vsyncpa [#allocation6], 0 }
   0x2   :  { %9 = vsyncpa [#allocation4], 0  ;;  %s301_s9 = smov [#allocation2]   ;;  %s229_s13 = scalar_lea.hbm %s365_s0, 256 }
   0x3   :  { %s15_s10 = sshll.u32 %s301_s9, 4  ;;  %p230_p0 = scmp.ne.s32.totalorder %s365_s0, %s229_s13  ;;  %s16_s10 = int_to_ptr.vmem [resolvable:$true] %s15_s10 }
   0x4   :  { %p233_p1 = scmp.lt.u32.totalorder %s229_s13, %s365_s0 }
   0x6   :  { %p235_p2 = pnand %p233_p1, %p230_p0 }
   0x8   :  { %238 = shalt.err (!%p235_p2)
}
   0x9   :  { %s239_s18 = scalar_lea.vmem %s16_s10, 256  ;;  %p244_p4 = scmp.lt.s32.totalorder %s16_s10, %s16_s10 }
   0xa   :  { %p240_p3 = scmp.ne.s32.totalorder %s16_s10, %s239_s18  ;;  %p245_p5 = scmp.lt.s32.totalorder %s239_s18, %s239_s18 }
   0xc   :  { %p246_p6 = por %p245_p5, %p244_p4 }
   0xe   :  { %p247_p7 = pnand %p246_p6, %p240_p3 }
  0x10   :  { %250 = shalt.err (!%p247_p7)
}
  0x11   :  { %s302_s19 = smov 128   ;;  %s303_s20 = smov 8  }
  0x12   :  { %21 = dma.hbm_to_vmem [thread:$0]  %s365_s0, 256, %s16_s10, [#allocation3], %s302_s19, %s302_s19, %s303_s20  }
  0x13   :  { %s304_s23 = smov [#allocation5]   ;;  %s251_s27 = scalar_lea.hbm %s366_s1, 512 }
  0x14   :  { %s27_s24 = sshll.u32 %s304_s23, 4  ;;  %p252_p8 = scmp.ne.s32.totalorder %s366_s1, %s251_s27  ;;  %s28_s24 = int_to_ptr.vmem [resolvable:$true] %s27_s24 }
  0x15   :  { %p255_p9 = scmp.lt.u32.totalorder %s251_s27, %s366_s1 }
  0x17   :  { %p257_p10 = pnand %p255_p9, %p252_p8 }
  0x19   :  { %260 = shalt.err (!%p257_p10)
}
  0x1a   :  { %s261_s4 = scalar_lea.vmem %s28_s24, 512  ;;  %p266_p12 = scmp.lt.s32.totalorder %s28_s24, %s28_s24 }
  0x1b   :  { %p262_p11 = scmp.ne.s32.totalorder %s28_s24, %s261_s4  ;;  %p267_p13 = scmp.lt.s32.totalorder %s261_s4, %s261_s4 }
  0x1d   :  { %p268_p0 = por %p267_p13, %p266_p12 }
  0x1f   :  { %p269_p1 = pnand %p268_p0, %p262_p11 }
  0x21   :  { %272 = shalt.err (!%p269_p1)
}
  0x22   :  { %33 = dma.hbm_to_vmem [thread:$0]  %s366_s1, 512, %s28_s24, [#allocation6], %s302_s19, %s302_s19, %s303_s20  }
  0x23   :  { %295 = dma.done.wait [#allocation3], 256  }
  0x24   :  { %296 = vsyncadd [#allocation3], 4294967040 }
  0x25   :  { %297 = dma.done.wait [#allocation6], 512  }
  0x26   :  { %298 = vsyncadd [#allocation6], 4294966784  ;;  %vm46_vm0 = vcmask 261120   ;;  %v42_v0 = vld [vmem:[#allocation5] sm:$0xff]  ;;  %v43_v1 = vld [vmem:[#allocation5 + $0x8] sm:$0xff]  ;;  %s305_s1 = smov [#allocation7]  }
  0x27   :  { %v44_v2 = vld [vmem:[#allocation5 + $0x10] sm:$0xff]  ;;  %v208_v3 = vpack.c.bf16 %v43_v1, %v42_v0  ;;  %v45_v4 = vld [vmem:[#allocation5 + $0x18] sm:$0xff]  ;;  %s179_s6 = sshll.u32 %s305_s1, 4  ;;  %vm168_vm1 = vcmask 1041409   ;;  %vm171_vm2 = vcmask 254976   ;;  %s180_s6 = int_to_ptr.vmem [resolvable:$true] %s179_s6 }
  0x28   :  { %v40_v5 = vld [vmem:[#allocation2] sm:$0xff]  ;;  %v212_v6 = vpack.c.bf16 %v45_v4, %v44_v2  ;;  %v41_v7 = vld [vmem:[#allocation2 + $0x8] sm:$0xff]  ;;  %s273_s7 = scalar_lea.vmem %s180_s6, 32  ;;  %p278_p3 = scmp.lt.s32.totalorder %s180_s6, %s180_s6 }
  0x29   :  { %205 = vmatprep.mubr.msk.f32.mxu0 %vm46_vm0, %v40_v5  ;;  %209 = vmatprep.subr.bf16.mxu0 %v208_v3  ;;  %p274_p2 = scmp.ne.s32.totalorder %s180_s6, %s273_s7  ;;  %p279_p4 = scmp.lt.s32.totalorder %s273_s7, %s273_s7 }
  0x2a   :  { %211 = vmatpush3.bf16.msra.mxu0 %v208_v3 }
  0x2b   :  { %213 = vmatprep.subr.bf16.mxu0 %v212_v6  ;;  %p280_p5 = por %p279_p4, %p278_p3 }
  0x2d   :  { %p281_p6 = pnand %p280_p5, %p274_p2 }
  0x2e   :  { %215 = vmatpush3.bf16.msra.mxu0 %v212_v6 }
  0x31   :  { %206 = vmatmul.mubr.msk.f32.vlgmr.msra.gmra.mrb[0].mxu0 %vm46_vm0, %v41_v7 }
 0x104   :  { %v207_v8 = vpop.f32.mrb[0].mxu0 }
 0x105   :  { %v119_v9 = vpop.f32.mrb[1].mxu0  ;;  %v131_v11 = vsel %vm46_vm0, %v207_v8, -inf }
 0x106   :  { %v128_v10 = vsel %vm46_vm0, %v119_v9, -inf }
 0x107   :  { %129 = vmax.xlane.f32.xlu0 %v128_v10 }
 0x10b   :  { %132 = vmax.xlane.f32.xlu0 %v131_v11 }
 0x194   :  { %v130_v12 = vpop.xlane.xlu0 %129 }
 0x195   :  { %v134_v13 = vsub.f32 %v119_v9, %v130_v12 }
 0x197   :  { %v136_v14 = vmul.f32 1.442695, %v134_v13 }
 0x198   :  { %v133_v15 = vpop.xlane.xlu0 %132 }
 0x199   :  { %221 = vpow2.f32 %v136_v14  ;;  %v135_v16 = vsub.f32 %v207_v8, %v133_v15 }
 0x19b   :  { %v138_v17 = vmul.f32 1.442695, %v135_v16 }
 0x19d   :  { %223 = vpow2.f32 %v138_v17 }
 0x1a3   :  { %v222_v18 = vpop.eup %221 }
 0x1a4   :  { %v140_v19 = vsel %vm46_vm0, %v222_v18, 0.0 }
 0x1a5   :  { %141 = vadd.xlane.f32.xlu1 %v140_v19 }
 0x1a7   :  { %v224_v20 = vpop.eup %223 }
 0x1a8   :  { %v143_v21 = vsel %vm46_vm0, %v224_v20, 0.0 }
 0x1a9   :  { %144 = vadd.xlane.f32.xlu1 %v143_v21 }
 0x232   :  { %v142_v22 = vpop.xlane.xlu1 %141 }
 0x233   :  { %225 = vrcp.f32 %v142_v22 }
 0x236   :  { %v145_v23 = vpop.xlane.xlu1 %144 }
 0x237   :  { %227 = vrcp.f32 %v145_v23 }
 0x23d   :  { %v226_v24 = vpop.eup %225 }
 0x23e   :  { %v148_v25 = vmul.f32 %v226_v24, %v222_v18 }
 0x240   :  { %v150_v26 = vmul.f32 %v148_v25, %v40_v5 }
 0x241   :  { %v228_v27 = vpop.eup %227 }
 0x242   :  { %v149_v28 = vmul.f32 %v228_v27, %v224_v20  ;;  %v152_v29 = vsel %vm46_vm0, %v150_v26, 0.0 }
 0x243   :  { %v153_v30 = vrot.slane %v152_v29, 4 }
 0x244   :  { %v151_v31 = vmul.f32 %v149_v28, %v41_v7 }
 0x245   :  { %v154_v32 = vadd.f32 %v153_v30, %v152_v29 }
 0x246   :  { %v159_v33 = vsel %vm46_vm0, %v151_v31, 0.0 }
 0x247   :  { %v155_v34 = vrot.slane %v154_v32, 2  ;;  %v160_v35 = vrot.slane %v159_v33, 4 }
 0x249   :  { %v156_v36 = vadd.f32 %v155_v34, %v154_v32  ;;  %v161_v37 = vadd.f32 %v160_v35, %v159_v33 }
 0x24b   :  { %v162_v38 = vrot.slane %v161_v37, 2  ;;  %v157_v39 = vrot.slane %v156_v36, 1 }
 0x24d   :  { %v163_v40 = vadd.f32 %v162_v38, %v161_v37  ;;  %v158_v42 = vadd.f32 %v157_v39, %v156_v36 }
 0x24f   :  { %v164_v41 = vrot.slane %v163_v40, 1 }
 0x251   :  { %v165_v43 = vadd.f32 %v164_v41, %v163_v40 }
 0x253   :  { %v169_v44 = vsel %vm168_vm1, %v165_v43, %v158_v42 }
 0x254   :  { %172 = vst.msk [vmem:[#allocation7] sm:$0x3] %vm171_vm2, %v169_v44 }
 0x255   :  { %284 = shalt.err (!%p281_p6)
}
 0x256   :  { %s285_s10 = scalar_lea.hbm %s367_s2, 32 }
 0x257   :  { %p286_p7 = scmp.ne.s32.totalorder %s367_s2, %s285_s10  ;;  %p289_p8 = scmp.lt.u32.totalorder %s285_s10, %s367_s2 }
 0x259   :  { %p291_p9 = pnand %p289_p8, %p286_p7 }
 0x25b   :  { %294 = shalt.err (!%p291_p9)
}
 0x25c   :  { %182 = dma.vmem_to_hbm [thread:$0]  %s180_s6, 32, %s367_s2, [#allocation4]  }
 0x25d   :  { %299 = dma.done.wait [#allocation4], 32  }
 0x25e   :  { %300 = vsyncadd [#allocation4], 4294967264 }
 0x25f   :  { %186 = vsyncpa [#allocation3], 1 }
 0x260   :  { %187 = vsyncpa [#allocation6], 1 }
 0x261   :  { %188 = vsyncpa [#allocation4], 1 }

// kernel: tpu_custom_call.1
= control target key start
LH: loop header
LB: loop body
LE: loop exit
PB: predicated region body
PF: predicated region fallthrough
CT: control target
= control target key end

     0   :  { %7 = vsyncpa [#allocation3], 0  ;;  %s365_s0 = inlined_call_operand.hbm [shape: f32[16,32], index: 0, kind: input, shape index: {}]   ;;  %s366_s1 = inlined_call_operand.hbm [shape: f32[32,32], index: 1, kind: input, shape index: {}]   ;;  %s367_s2 = inlined_call_operand.hbm [shape: f32[2,32], index: 2, kind: output, shape index: {}]  }
   0x1   :  { %8 = vsyncpa [#allocation6], 0 }
   0x2   :  { %9 = vsyncpa [#allocation4], 0  ;;  %s301_s9 = smov [#allocation2]   ;;  %s229_s13 = scalar_lea.hbm %s365_s0, 256 }
   0x3   :  { %s15_s10 = sshll.u32 %s301_s9, 4  ;;  %p230_p0 = scmp.ne.s32.totalorder %s365_s0, %s229_s13  ;;  %s16_s10 = int_to_ptr.vmem [resolvable:$true] %s15_s10 }
   0x4   :  { %p233_p1 = scmp.lt.u32.totalorder %s229_s13, %s365_s0 }
   0x6   :  { %p235_p2 = pnand %p233_p1, %p230_p0 }
   0x8   :  { %238 = shalt.err (!%p235_p2)
}
   0x9   :  { %s239_s18 = scalar_lea.vmem %s16_s10, 256  ;;  %p244_p4 = scmp.lt.s32.totalorder %s16_s10, %s16_s10 }
   0xa   :  { %p240_p3 = scmp.ne.s32.totalorder %s16_s10, %s239_s18  ;;  %p245_p5 = scmp.lt.s32.totalorder %s239_s18, %s239_s18 }
   0xc   :  { %p246_p6 = por %p245_p5, %p244_p4 }
   0xe   :  { %p247_p7 = pnand %p246_p6, %p240_p3 }
  0x10   :  { %250 = shalt.err (!%p247_p7)
}
  0x11   :  { %s302_s19 = smov 128   ;;  %s303_s20 = smov 8  }
  0x12   :  { %21 = dma.hbm_to_vmem [thread:$0]  %s365_s0, 256, %s16_s10, [#allocation3], %s302_s19, %s302_s19, %s303_s20  }
  0x13   :  { %s304_s23 = smov [#allocation5]   ;;  %s251_s27 = scalar_lea.hbm %s366_s1, 512 }
  0x14   :  { %s27_s24 = sshll.u32 %s304_s23, 4  ;;  %p252_p8 = scmp.ne.s32.totalorder %s366_s1, %s251_s27  ;;  %s28_s24 = int_to_ptr.vmem [resolvable:$true] %s27_s24 }
  0x15   :  { %p255_p9 = scmp.lt.u32.totalorder %s251_s27, %s366_s1 }
  0x17   :  { %p257_p10 = pnand %p255_p9, %p252_p8 }
  0x19   :  { %260 = shalt.err (!%p257_p10)
}
  0x1a   :  { %s261_s4 = scalar_lea.vmem %s28_s24, 512  ;;  %p266_p12 = scmp.lt.s32.totalorder %s28_s24, %s28_s24 }
  0x1b   :  { %p262_p11 = scmp.ne.s32.totalorder %s28_s24, %s261_s4  ;;  %p267_p13 = scmp.lt.s32.totalorder %s261_s4, %s261_s4 }
  0x1d   :  { %p268_p0 = por %p267_p13, %p266_p12 }
  0x1f   :  { %p269_p1 = pnand %p268_p0, %p262_p11 }
  0x21   :  { %272 = shalt.err (!%p269_p1)
}
  0x22   :  { %33 = dma.hbm_to_vmem [thread:$0]  %s366_s1, 512, %s28_s24, [#allocation6], %s302_s19, %s302_s19, %s303_s20  }
  0x23   :  { %295 = dma.done.wait [#allocation3], 256  }
  0x24   :  { %296 = vsyncadd [#allocation3], 4294967040 }
  0x25   :  { %297 = dma.done.wait [#allocation6], 512  }
  0x26   :  { %298 = vsyncadd [#allocation6], 4294966784  ;;  %vm46_vm0 = vcmask 261120   ;;  %v42_v0 = vld [vmem:[#allocation5] sm:$0xff]  ;;  %v43_v1 = vld [vmem:[#allocation5 + $0x8] sm:$0xff]  ;;  %s305_s1 = smov [#allocation7]  }
  0x27   :  { %v44_v2 = vld [vmem:[#allocation5 + $0x10] sm:$0xff]  ;;  %v208_v3 = vpack.c.bf16 %v43_v1, %v42_v0  ;;  %v45_v4 = vld [vmem:[#allocation5 + $0x18] sm:$0xff]  ;;  %s179_s6 = sshll.u32 %s305_s1, 4  ;;  %vm168_vm1 = vcmask 1041409   ;;  %vm171_vm2 = vcmask 254976   ;;  %s180_s6 = int_to_ptr.vmem [resolvable:$true] %s179_s6 }
  0x28   :  { %v40_v5 = vld [vmem:[#allocation2] sm:$0xff]  ;;  %v212_v6 = vpack.c.bf16 %v45_v4, %v44_v2  ;;  %v41_v7 = vld [vmem:[#allocation2 + $0x8] sm:$0xff]  ;;  %s273_s7 = scalar_lea.vmem %s180_s6, 32  ;;  %p278_p3 = scmp.lt.s32.totalorder %s180_s6, %s180_s6 }
  0x29   :  { %205 = vmatprep.mubr.msk.f32.mxu0 %vm46_vm0, %v40_v5  ;;  %209 = vmatprep.subr.bf16.mxu0 %v208_v3  ;;  %p274_p2 = scmp.ne.s32.totalorder %s180_s6, %s273_s7  ;;  %p279_p4 = scmp.lt.s32.totalorder %s273_s7, %s273_s7 }
  0x2a   :  { %211 = vmatpush3.bf16.msra.mxu0 %v208_v3 }
  0x2b   :  { %213 = vmatprep.subr.bf16.mxu0 %v212_v6  ;;  %p280_p5 = por %p279_p4, %p278_p3 }
  0x2d   :  { %p281_p6 = pnand %p280_p5, %p274_p2 }
  0x2e   :  { %215 = vmatpush3.bf16.msra.mxu0 %v212_v6 }
  0x31   :  { %206 = vmatmul.mubr.msk.f32.vlgmr.msra.gmra.mrb[0].mxu0 %vm46_vm0, %v41_v7 }
 0x104   :  { %v207_v8 = vpop.f32.mrb[0].mxu0 }
 0x105   :  { %v119_v9 = vpop.f32.mrb[1].mxu0  ;;  %v131_v11 = vsel %vm46_vm0, %v207_v8, -inf }
 0x106   :  { %v128_v10 = vsel %vm46_vm0, %v119_v9, -inf }
 0x107   :  { %129 = vmax.xlane.f32.xlu0 %v128_v10 }
 0x10b   :  { %132 = vmax.xlane.f32.xlu0 %v131_v11 }
 0x194   :  { %v130_v12 = vpop.xlane.xlu0 %129 }
 0x195   :  { %v134_v13 = vsub.f32 %v119_v9, %v130_v12 }
 0x197   :  { %v136_v14 = vmul.f32 1.442695, %v134_v13 }
 0x198   :  { %v133_v15 = vpop.xlane.xlu0 %132 }
 0x199   :  { %221 = vpow2.f32 %v136_v14  ;;  %v135_v16 = vsub.f32 %v207_v8, %v133_v15 }
 0x19b   :  { %v138_v17 = vmul.f32 1.442695, %v135_v16 }
 0x19d   :  { %223 = vpow2.f32 %v138_v17 }
 0x1a3   :  { %v222_v18 = vpop.eup %221 }
 0x1a4   :  { %v140_v19 = vsel %vm46_vm0, %v222_v18, 0.0 }
 0x1a5   :  { %141 = vadd.xlane.f32.xlu1 %v140_v19 }
 0x1a7   :  { %v224_v20 = vpop.eup %223 }
 0x1a8   :  { %v143_v21 = vsel %vm46_vm0, %v224_v20, 0.0 }
 0x1a9   :  { %144 = vadd.xlane.f32.xlu1 %v143_v21 }
 0x232   :  { %v142_v22 = vpop.xlane.xlu1 %141 }
 0x233   :  { %225 = vrcp.f32 %v142_v22 }
 0x236   :  { %v145_v23 = vpop.xlane.xlu1 %144 }
 0x237   :  { %227 = vrcp.f32 %v145_v23 }
 0x23d   :  { %v226_v24 = vpop.eup %225 }
 0x23e   :  { %v148_v25 = vmul.f32 %v226_v24, %v222_v18 }
 0x240   :  { %v150_v26 = vmul.f32 %v148_v25, %v40_v5 }
 0x241   :  { %v228_v27 = vpop.eup %227 }
 0x242   :  { %v149_v28 = vmul.f32 %v228_v27, %v224_v20  ;;  %v152_v29 = vsel %vm46_vm0, %v150_v26, 0.0 }
 0x243   :  { %v153_v30 = vrot.slane %v152_v29, 4 }
 0x244   :  { %v151_v31 = vmul.f32 %v149_v28, %v41_v7 }
 0x245   :  { %v154_v32 = vadd.f32 %v153_v30, %v152_v29 }
 0x246   :  { %v159_v33 = vsel %vm46_vm0, %v151_v31, 0.0 }
 0x247   :  { %v155_v34 = vrot.slane %v154_v32, 2  ;;  %v160_v35 = vrot.slane %v159_v33, 4 }
 0x249   :  { %v156_v36 = vadd.f32 %v155_v34, %v154_v32  ;;  %v161_v37 = vadd.f32 %v160_v35, %v159_v33 }
 0x24b   :  { %v162_v38 = vrot.slane %v161_v37, 2  ;;  %v157_v39 = vrot.slane %v156_v36, 1 }
 0x24d   :  { %v163_v40 = vadd.f32 %v162_v38, %v161_v37  ;;  %v158_v42 = vadd.f32 %v157_v39, %v156_v36 }
 0x24f   :  { %v164_v41 = vrot.slane %v163_v40, 1 }
 0x251   :  { %v165_v43 = vadd.f32 %v164_v41, %v163_v40 }
 0x253   :  { %v169_v44 = vsel %vm168_vm1, %v165_v43, %v158_v42 }
 0x254   :  { %172 = vst.msk [vmem:[#allocation7] sm:$0x3] %vm171_vm2, %v169_v44 }
 0x255   :  { %284 = shalt.err (!%p281_p6)
}
 0x256   :  { %s285_s10 = scalar_lea.hbm %s367_s2, 32 }
 0x257   :  { %p286_p7 = scmp.ne.s32.totalorder %s367_s2, %s285_s10  ;;  %p289_p8 = scmp.lt.u32.totalorder %s285_s10, %s367_s2 }
 0x259   :  { %p291_p9 = pnand %p289_p8, %p286_p7 }
 0x25b   :  { %294 = shalt.err (!%p291_p9)
}
 0x25c   :  { %182 = dma.vmem_to_hbm [thread:$0]  %s180_s6, 32, %s367_s2, [#allocation4]  }
 0x25d   :  { %299 = dma.done.wait [#allocation4], 32  }
 0x25e   :  { %300 = vsyncadd [#allocation4], 4294967264 }
 0x25f   :  { %186 = vsyncpa [#allocation3], 1 }
 0x260   :  { %187 = vsyncpa [#allocation6], 1 }
 0x261   :  { %188 = vsyncpa [#allocation4], 1 }

</bundles_post_ra>
